<compile_context>
chip_gen: v7x
topology: tpu7x:2x2x1
jax: 0.10.0
libtpu: 0.0.40
codegen_flags: <defaults>
</compile_context>

<pallas_src>
import functools

import jax
import jax.numpy as jnp
from jax import lax
from jax.experimental import pallas as pl
from jax.experimental.pallas import tpu as pltpu


def _supcon_kernel(feat_r_ref, feat_c_ref, labs_i_ref, labs_j_ref,
                   idx_i_ref, idx_j_ref, loss_ref, num_acc, den_acc,
                   *, inv_temp, lanes):
    # feat_r_ref: (TM, D)  matmul dtype, normalized rows pre-scaled by 1/temperature
    # feat_c_ref: (TC, D)  matmul dtype, normalized cols (unscaled)
    # labs_*    : (TM,1)/(1,TC) int32 labels
    # idx_*     : (TM,1)/(1,TC) int32 global row/col indices (diagonal exclusion)
    # loss_ref  : (TM, 1) f32 per-row loss (epilogue)
    # num_acc/den_acc: (TM, lanes) f32 VMEM accumulators, resident across the j axis
    j = pl.program_id(1)

    @pl.when(j == 0)
    def _():
        num_acc[...] = jnp.zeros_like(num_acc)
        den_acc[...] = jnp.zeros_like(den_acc)

    # (TM, D) x (TC, D) contracting on the shared last (lane) dim -> (TM, TC) on the
    # MXU with f32 accumulation; no transpose, no per-tile cast, no per-tile scale
    # (temperature already folded into the row operand in the wrapper).
    sim = lax.dot_general(
        feat_r_ref[...], feat_c_ref[...],
        dimension_numbers=(((1,), (1,)), ((), ())),
        preferred_element_type=jnp.float32,
    )

    # Max-shift by the analytic bound 1/temperature (||f|| == 1) so exp never
    # overflows for small temperatures.  EUP op; shift cancels exactly in the logs.
    e = jnp.exp(sim - jnp.float32(inv_temp))                       # (TM, TC)

    not_diag = idx_i_ref[...] != idx_j_ref[...]                    # (TM,1)!=(1,TC) -> (TM,TC)
    same = labs_i_ref[...] == labs_j_ref[...]
    e_den = jnp.where(not_diag, e, 0.0)                            # exact diag removal
    e_num = jnp.where(same, e_den, 0.0)

    # Lane-chunked accumulation on the VALU; the cross-lane reduce is deferred to
    # the epilogue so the XLU sees O(N) work instead of O(N^2 / lanes).
    nch = e.shape[1] // lanes
    num_part = e_num[:, :lanes]
    den_part = e_den[:, :lanes]
    for c in range(1, nch):
        sl = slice(c * lanes, (c + 1) * lanes)
        num_part = num_part + e_num[:, sl]
        den_part = den_part + e_den[:, sl]
    num_acc[...] += num_part
    den_acc[...] += den_part

    @pl.when(j == pl.num_programs(1) - 1)
    def _():
        # eps rescaled by exp(-1/temp) so that
        #   log(den_shifted + eps') - log(num_shifted + eps')
        #     == log(den + 1e-8) - log(num + 1e-8)
        # i.e. exactly the reference -log((num+1e-8)/(den+1e-8)).
        # TODO(synk): for temperature < ~1/80 this eps underflows in f32 (the
        # reference itself overflows exp() there).
        eps = jnp.float32(1e-8) * jnp.exp(jnp.float32(-inv_temp))
        num = jnp.sum(num_acc[...], axis=1, keepdims=True) + eps
        den = jnp.sum(den_acc[...], axis=1, keepdims=True) + eps
        loss_ref[...] = jnp.log(den) - jnp.log(num)


def _pick_tile(n, target, unit):
    """Largest tile <= target that divides n and is a multiple of `unit`;
    falls back to the full dimension (a full-extent block is always legal)."""
    if n <= target:
        return n
    t = (target // unit) * unit
    while t >= unit:
        if n % t == 0:
            return t
        t -= unit
    return n


def supervised_contrastive_loss(features, labels, temperature, *,
                                row_tile=512, col_tile=512,
                                matmul_dtype=jnp.bfloat16):
    """features: (B, V, D) float, labels: (B,) int -> scalar float32 loss.

    matmul_dtype=jnp.bfloat16 (default) runs the fast MXU path (~1e-3 relative
    error on similarities); pass jnp.float32 for exact parity with the reference.
    """
    B, V, D = features.shape
    N = B * V
    inv_temp = float(1.0 / temperature)

    # --- Preprocessing hoisted out of the kernel (one O(N*D) pass) -------------
    x = features.reshape(N, D).astype(jnp.float32)
    # L2-normalize in f32 (rsqrt-multiply), equivalent to F.normalize(p=2, eps=1e-12).
    inv_norm = lax.rsqrt(jnp.maximum(jnp.sum(x * x, axis=-1, keepdims=True), 1e-24))
    feat_n = x * inv_norm
    # Fold 1/temperature into the ROW operand only -> MXU output is already sim/T.
    feat_rows = (feat_n * jnp.float32(inv_temp)).astype(matmul_dtype)
    feat_cols = feat_n.astype(matmul_dtype)

    labs = jnp.repeat(labels.astype(jnp.int32), V)                 # (N,)
    labs_i = labs.reshape(N, 1)
    labs_j = labs.reshape(1, N)
    idx = jnp.arange(N, dtype=jnp.int32)
    idx_i = idx.reshape(N, 1)
    idx_j = idx.reshape(1, N)

    # --- Tiling ----------------------------------------------------------------
    # Row tile is resident across the col axis, so TM is the lever that cuts
    # col-feature re-streaming; keep >= 2 row blocks when possible (v7x megacore).
    tm_target = row_tile
    if row_tile < N < 2 * row_tile:
        tm_target = max(8, N // 2)
    TM = _pick_tile(N, tm_target, 8)      # sublane-aligned row tile
    TC = _pick_tile(N, col_tile, 128)     # lane-aligned col tile
    grid = (N // TM, N // TC)
    lanes = 128 if TC % 128 == 0 else TC  # lane-chunk width for the accumulators

    kernel = functools.partial(_supcon_kernel, inv_temp=inv_temp, lanes=lanes)

    bpe = jnp.dtype(matmul_dtype).itemsize
    cost = pl.CostEstimate(
        flops=2 * N * N * D,
        transcendentals=N * N,
        # col features are re-streamed once per row tile; rows stay resident.
        bytes_accessed=bpe * N * D * (1 + grid[0]) + 20 * N,
    )

    loss_rows = pl.pallas_call(
        kernel,
        out_shape=jax.ShapeDtypeStruct((N, 1), jnp.float32),
        grid_spec=pltpu.PrefetchScalarGridSpec(
            num_scalar_prefetch=0,
            grid=grid,
            in_specs=[
                pl.BlockSpec((TM, D), lambda i, j: (i, 0)),   # row features (scaled)
                pl.BlockSpec((TC, D), lambda i, j: (j, 0)),   # col features
                pl.BlockSpec((TM, 1), lambda i, j: (i, 0)),   # row labels
                pl.BlockSpec((1, TC), lambda i, j: (0, j)),   # col labels
                pl.BlockSpec((TM, 1), lambda i, j: (i, 0)),   # row global indices
                pl.BlockSpec((1, TC), lambda i, j: (0, j)),   # col global indices
            ],
            out_specs=pl.BlockSpec((TM, 1), lambda i, j: (i, 0)),
            scratch_shapes=[
                pltpu.VMEM((TM, lanes), jnp.float32),         # numerator accumulator
                pltpu.VMEM((TM, lanes), jnp.float32),         # denominator accumulator
            ],
        ),
        compiler_params=pltpu.CompilerParams(
            dimension_semantics=("parallel", "arbitrary"),
            # v5e default scoped VMEM is only 16 MiB; stay under v7x's 64 MiB physical.
            vmem_limit_bytes=48 * 1024 * 1024,
        ),
        cost_estimate=cost,
    )(feat_rows, feat_cols, labs_i, labs_j, idx_i, idx_j)

    # Tiny final reduction outside the kernel (keeps the row axis megacore-shardable).
    return jnp.mean(loss_rows)


def _reference(features, labels, temperature):
    """Pure-JAX reference mirroring the PyTorch module."""
    B, V, D = features.shape
    feat = features / jnp.maximum(
        jnp.linalg.norm(features, axis=2, keepdims=True), 1e-12
    )
    feat = feat.reshape(B * V, D)
    labs = jnp.repeat(labels, V)
    sim = (feat @ feat.T) / temperature
    mask = (labs[None, :] == labs[:, None]).astype(jnp.float32)
    mask = mask * (1.0 - jnp.eye(B * V, dtype=jnp.float32))
    exp_sim = jnp.exp(sim)
    num = jnp.sum(exp_sim * mask, axis=1)
    den = jnp.sum(exp_sim, axis=1) - jnp.exp(jnp.diagonal(sim))
    loss = -jnp.log((num + 1e-8) / (den + 1e-8))
    return jnp.mean(loss)


if __name__ == "__main__":
    key = jax.random.PRNGKey(0)
    k_feat, k_lab = jax.random.split(key)

    B, V, D = 2, 4, 32
    temperature = 0.5

    features = jax.random.normal(k_feat, (B, V, D), dtype=jnp.float32)
    labels = jax.random.randint(k_lab, (B,), 0, 2, dtype=jnp.int32)

    ref = jax.block_until_ready(_reference(features, labels, temperature))

    # Exact-parity path (f32 matmul operands).
    out_f32 = jax.block_until_ready(
        supervised_contrastive_loss(features, labels, temperature,
                                    matmul_dtype=jnp.float32))
    assert jnp.allclose(out_f32, ref, rtol=1e-5, atol=1e-5), (out_f32, ref)

    # Default fast path (bf16 MXU operands); tolerance limited by bf16 features.
    out_bf16 = jax.block_until_ready(
        supervised_contrastive_loss(features, labels, temperature))
    assert jnp.allclose(out_bf16, ref, rtol=2e-2, atol=2e-2), (out_bf16, ref)

    print("KERNEL_OK")
</pallas_src>

<mosaic_0001>
module attributes {stable_mosaic.version = 11 : i64} {
  func.func @_supcon_kernel(%arg0: i32, %arg1: i32, %arg2: memref<8x32xf32, #tpu.memory_space<vmem>>, %arg3: memref<8x32xf32, #tpu.memory_space<vmem>>, %arg4: memref<8x1xi32, #tpu.memory_space<vmem>>, %arg5: memref<1x8xi32, #tpu.memory_space<vmem>>, %arg6: memref<8x1xi32, #tpu.memory_space<vmem>>, %arg7: memref<1x8xi32, #tpu.memory_space<vmem>>, %arg8: memref<8x1xf32, #tpu.memory_space<vmem>>, %arg9: memref<8x8xf32, #tpu.memory_space<vmem>>, %arg10: memref<8x8xf32, #tpu.memory_space<vmem>>) attributes {dimension_semantics = [#tpu.dimension_semantics<parallel>, #tpu.dimension_semantics<arbitrary>], iteration_bounds = array<i64: 1, 1>, scalar_prefetch = 0 : i64, scratch_operands = 2 : i64, tpu.core_type = #tpu.core_type<tc>, window_params = [{transform_indices = @transform_0, window_bounds = array<i64: 8, 32>}, {transform_indices = @transform_1, window_bounds = array<i64: 8, 32>}, {transform_indices = @transform_2, window_bounds = array<i64: 8, 1>}, {transform_indices = @transform_3, window_bounds = array<i64: 1, 8>}, {transform_indices = @transform_4, window_bounds = array<i64: 8, 1>}, {transform_indices = @transform_5, window_bounds = array<i64: 1, 8>}, {transform_indices = @transform_6, window_bounds = array<i64: 8, 1>}]} {
    %c0_i32 = arith.constant 0 : i32
    %0 = arith.cmpi eq, %arg1, %c0_i32 : i32
    %1 = arith.extui %0 : i1 to i32
    %c0_i32_0 = arith.constant 0 : i32
    %2 = arith.cmpi ne, %1, %c0_i32_0 : i32
    scf.if %2 {
      %cst_25 = arith.constant 0.000000e+00 : f32
      %32 = vector.broadcast %cst_25 : f32 to vector<8x8xf32>
      %c0_26 = arith.constant 0 : index
      %c0_27 = arith.constant 0 : index
      %33 = vector.load %arg9[%c0_26, %c0_27] : memref<8x8xf32, #tpu.memory_space<vmem>>, vector<8x8xf32>
      tpu.vector_store %arg9[%c0_26, %c0_27], %32 {strides = array<i32>} : memref<8x8xf32, #tpu.memory_space<vmem>>, vector<8x8xf32>,
      %cst_28 = arith.constant 0.000000e+00 : f32
      %34 = vector.broadcast %cst_28 : f32 to vector<8x8xf32>
      %c0_29 = arith.constant 0 : index
      %c0_30 = arith.constant 0 : index
      %35 = vector.load %arg10[%c0_29, %c0_30] : memref<8x8xf32, #tpu.memory_space<vmem>>, vector<8x8xf32>
      tpu.vector_store %arg10[%c0_29, %c0_30], %34 {strides = array<i32>} : memref<8x8xf32, #tpu.memory_space<vmem>>, vector<8x8xf32>,
    } else {
    }
    %c0 = arith.constant 0 : index
    %c0_1 = arith.constant 0 : index
    %3 = vector.load %arg2[%c0, %c0_1] : memref<8x32xf32, #tpu.memory_space<vmem>>, vector<8x32xf32>
    %c0_2 = arith.constant 0 : index
    %c0_3 = arith.constant 0 : index
    %4 = vector.load %arg3[%c0_2, %c0_3] : memref<8x32xf32, #tpu.memory_space<vmem>>, vector<8x32xf32>
    %cst = arith.constant dense<0.000000e+00> : vector<8x8xf32>
    %5 = tpu.matmul %3, %4, %cst {dimension_numbers = #tpu.dot_dimension_numbers<[1], [1], [0], [0], [0, 0, 1, 0], [], []>} : vector<8x32xf32>, vector<8x32xf32>, vector<8x8xf32> -> vector<8x8xf32>
    %cst_4 = arith.constant 2.000000e+00 : f32
    %6 = vector.broadcast %cst_4 : f32 to vector<8x8xf32>
    %7 = arith.subf %5, %6 : vector<8x8xf32>
    %8 = math.exp %7 : vector<8x8xf32>
    %c0_5 = arith.constant 0 : index
    %c0_6 = arith.constant 0 : index
    %9 = vector.load %arg6[%c0_5, %c0_6] : memref<8x1xi32, #tpu.memory_space<vmem>>, vector<8x1xi32>
    %c0_7 = arith.constant 0 : index
    %c0_8 = arith.constant 0 : index
    %10 = vector.load %arg7[%c0_7, %c0_8] : memref<1x8xi32, #tpu.memory_space<vmem>>, vector<1x8xi32>
    %11 = vector.broadcast %9 : vector<8x1xi32> to vector<8x8xi32>
    %12 = vector.broadcast %10 : vector<1x8xi32> to vector<8x8xi32>
    %13 = arith.cmpi ne, %11, %12 : vector<8x8xi32>
    %c0_9 = arith.constant 0 : index
    %c0_10 = arith.constant 0 : index
    %14 = vector.load %arg4[%c0_9, %c0_10] : memref<8x1xi32, #tpu.memory_space<vmem>>, vector<8x1xi32>
    %c0_11 = arith.constant 0 : index
    %c0_12 = arith.constant 0 : index
    %15 = vector.load %arg5[%c0_11, %c0_12] : memref<1x8xi32, #tpu.memory_space<vmem>>, vector<1x8xi32>
    %16 = vector.broadcast %14 : vector<8x1xi32> to vector<8x8xi32>
    %17 = vector.broadcast %15 : vector<1x8xi32> to vector<8x8xi32>
    %18 = arith.cmpi eq, %16, %17 : vector<8x8xi32>
    %cst_13 = arith.constant 0.000000e+00 : f32
    %19 = vector.broadcast %cst_13 : f32 to vector<8x8xf32>
    %20 = arith.select %13, %8, %19 : vector<8x8xi1>, vector<8x8xf32>
    %cst_14 = arith.constant 0.000000e+00 : f32
    %21 = vector.broadcast %cst_14 : f32 to vector<8x8xf32>
    %22 = arith.select %18, %20, %21 : vector<8x8xi1>, vector<8x8xf32>
    %c0_15 = arith.constant 0 : index
    %c0_16 = arith.constant 0 : index
    %23 = vector.load %arg9[%c0_15, %c0_16] : memref<8x8xf32, #tpu.memory_space<vmem>>, vector<8x8xf32>
    %24 = arith.addf %23, %22 : vector<8x8xf32>
    %c0_17 = arith.constant 0 : index
    %c0_18 = arith.constant 0 : index
    %25 = vector.load %arg9[%c0_17, %c0_18] : memref<8x8xf32, #tpu.memory_space<vmem>>, vector<8x8xf32>
    tpu.vector_store %arg9[%c0_17, %c0_18], %24 {strides = array<i32>} : memref<8x8xf32, #tpu.memory_space<vmem>>, vector<8x8xf32>,
    %c0_19 = arith.constant 0 : index
    %c0_20 = arith.constant 0 : index
    %26 = vector.load %arg10[%c0_19, %c0_20] : memref<8x8xf32, #tpu.memory_space<vmem>>, vector<8x8xf32>
    %27 = arith.addf %26, %20 : vector<8x8xf32>
    %c0_21 = arith.constant 0 : index
    %c0_22 = arith.constant 0 : index
    %28 = vector.load %arg10[%c0_21, %c0_22] : memref<8x8xf32, #tpu.memory_space<vmem>>, vector<8x8xf32>
    tpu.vector_store %arg10[%c0_21, %c0_22], %27 {strides = array<i32>} : memref<8x8xf32, #tpu.memory_space<vmem>>, vector<8x8xf32>,
    %c0_i32_23 = arith.constant 0 : i32
    %29 = arith.cmpi eq, %arg1, %c0_i32_23 : i32
    %30 = arith.extui %29 : i1 to i32
    %c0_i32_24 = arith.constant 0 : i32
    %31 = arith.cmpi ne, %30, %c0_i32_24 : i32
    scf.if %31 {
      %cst_25 = arith.constant -2.000000e+00 : f32
      %32 = math.exp %cst_25 : f32
      %cst_26 = arith.constant 9.99999993E-9 : f32
      %33 = arith.mulf %cst_26, %32 : f32
      %c0_27 = arith.constant 0 : index
      %c0_28 = arith.constant 0 : index
      %34 = vector.load %arg9[%c0_27, %c0_28] : memref<8x8xf32, #tpu.memory_space<vmem>>, vector<8x8xf32>
      %cst_29 = arith.constant dense<0.000000e+00> : vector<8xf32>
      %35 = vector.multi_reduction <add>, %34, %cst_29 [1] : vector<8x8xf32> to vector<8xf32>
      %36 = vector.shape_cast %35 : vector<8xf32> to vector<8x1xf32>
      %37 = vector.broadcast %33 : f32 to vector<8x1xf32>
      %38 = arith.addf %36, %37 : vector<8x1xf32>
      %c0_30 = arith.constant 0 : index
      %c0_31 = arith.constant 0 : index
      %39 = vector.load %arg10[%c0_30, %c0_31] : memref<8x8xf32, #tpu.memory_space<vmem>>, vector<8x8xf32>
      %cst_32 = arith.constant dense<0.000000e+00> : vector<8xf32>
      %40 = vector.multi_reduction <add>, %39, %cst_32 [1] : vector<8x8xf32> to vector<8xf32>
      %41 = vector.shape_cast %40 : vector<8xf32> to vector<8x1xf32>
      %42 = vector.broadcast %33 : f32 to vector<8x1xf32>
      %43 = arith.addf %41, %42 : vector<8x1xf32>
      %44 = math.log %43 : vector<8x1xf32>
      %45 = math.log %38 : vector<8x1xf32>
      %46 = arith.subf %44, %45 : vector<8x1xf32>
      %c0_33 = arith.constant 0 : index
      %c0_34 = arith.constant 0 : index
      %47 = vector.load %arg8[%c0_33, %c0_34] : memref<8x1xf32, #tpu.memory_space<vmem>>, vector<8x1xf32>
      tpu.vector_store %arg8[%c0_33, %c0_34], %46 {strides = array<i32>} : memref<8x1xf32, #tpu.memory_space<vmem>>, vector<8x1xf32>,
    } else {
    }
    return
  }
  func.func @transform_0(%arg0: i32, %arg1: i32) -> (i32, i32) {
    %c0_i32 = arith.constant 0 : i32
    %c0_i32_0 = arith.constant 0 : i32
    return %arg0, %c0_i32 : i32, i32
  }
  func.func @transform_1(%arg0: i32, %arg1: i32) -> (i32, i32) {
    %c0_i32 = arith.constant 0 : i32
    %c0_i32_0 = arith.constant 0 : i32
    return %arg1, %c0_i32 : i32, i32
  }
  func.func @transform_2(%arg0: i32, %arg1: i32) -> (i32, i32) {
    %c0_i32 = arith.constant 0 : i32
    %c0_i32_0 = arith.constant 0 : i32
    return %arg0, %c0_i32 : i32, i32
  }
  func.func @transform_3(%arg0: i32, %arg1: i32) -> (i32, i32) {
    %c0_i32 = arith.constant 0 : i32
    %c0_i32_0 = arith.constant 0 : i32
    return %c0_i32, %arg1 : i32, i32
  }
  func.func @transform_4(%arg0: i32, %arg1: i32) -> (i32, i32) {
    %c0_i32 = arith.constant 0 : i32
    %c0_i32_0 = arith.constant 0 : i32
    return %arg0, %c0_i32 : i32, i32
  }
  func.func @transform_5(%arg0: i32, %arg1: i32) -> (i32, i32) {
    %c0_i32 = arith.constant 0 : i32
    %c0_i32_0 = arith.constant 0 : i32
    return %c0_i32, %arg1 : i32, i32
  }
  func.func @transform_6(%arg0: i32, %arg1: i32) -> (i32, i32) {
    %c0_i32 = arith.constant 0 : i32
    %c0_i32_0 = arith.constant 0 : i32
    return %arg0, %c0_i32 : i32, i32
  }
}

</mosaic_0001>

<bundles_post_ra>
// kernel: tpu_custom_call.1
= control target key start
LH: loop header
LB: loop body
LE: loop exit
PB: predicated region body
PF: predicated region fallthrough
CT: control target
= control target key end

     0   :  { %vm27_vm0 = vcmask 64512   ;;  %vm32_vm1 = vcmask 261120   ;;  %v187_v0 = vmov 0.0   ;;  %vm188_vm2 = vmmov 0   ;;  %s254_s1 = inlined_call_operand.vmem [shape: f32[8,32], index: 1, kind: input, shape index: {}]   ;;  %s255_s0 = inlined_call_operand.vmem [shape: f32[8,32], index: 0, kind: input, shape index: {}]   ;;  %s256_s4 = inlined_call_operand.vmem [shape: s32[8,1], index: 4, kind: input, shape index: {}]   ;;  %s257_s2 = inlined_call_operand.vmem [shape: s32[8,1], index: 2, kind: input, shape index: {}]   ;;  %s258_s5 = inlined_call_operand.vmem [shape: s32[1,8], index: 5, kind: input, shape index: {}]   ;;  %s259_s3 = inlined_call_operand.vmem [shape: s32[1,8], index: 3, kind: input, shape index: {}]   ;;  %s260_s6 = inlined_call_operand.vmem [shape: f32[8,1], index: 6, kind: output, shape index: {}]  }
   0x1   :  { %28 = vst.msk [vmem:[#allocation2] sm:$0xff] %vm27_vm0, %v187_v0  ;;  %29 = vst.msk [vmem:[#allocation3] sm:$0xff] %vm27_vm0, %v187_v0  ;;  %172 = vmatprep.subr.mxu0 %v187_v0  ;;  %v31_v1 = vld [vmem:[%s254_s1] sm:$0xff]  ;;  %174 = vmatprep.mubr.msk.f32.mxu0 %vm188_vm2, %v187_v0  ;;  %v189_v4 = vmov 0   ;;  %vm159_vm5 = vcmask 7168  }
   0x2   :  { %v112_v2 = vld [vmem:[%s256_s4] sm:$0xff]  ;;  %173 = vmatpush3.xpose.msk.msra.mxu0 %vm32_vm1, %v31_v1  ;;  %180 = vset.pattern.permute.xlu0 %v189_v4 }
   0x3   :  { %v30_v3 = vld [vmem:[%s255_s0] sm:$0xff]  ;;  %115 = vperm.xlu0 %180, %v112_v2  }
   0x4   :  { %v122_v5 = vld [vmem:[%s257_s2] sm:$0xff] }
   0x5   :  { %175 = vmatmul.mubr.msk.f32.vlgmr.msra.gmra.mrb[0].mxu0 %vm32_vm1, %v30_v3  ;;  %v168_v11 = vld [vmem:[%s258_s5] ss:$0 sm:$0xff] }
   0x6   :  { %v169_v12 = vld [vmem:[%s259_s3] ss:$0 sm:$0xff] }
   0x7   :  { %125 = vperm.xlu0 %180, %v122_v5  }
   0x8   :  { %v138_v14 = vld [vmem:[#allocation3] sm:$0xff]  ;;  %v134_v16 = vld [vmem:[#allocation2] sm:$0xff] }
  0x82   :  { %v116_v10 = vpop.permute.xlu0 %115 }
  0x83   :  { %vm121_vm3 = vcmp.ne.s32.totalorder %v116_v10, %v168_v11 }
  0x86   :  { %v126_v13 = vpop.permute.xlu0 %125 }
  0x87   :  { %vm131_vm4 = vcmp.eq.s32.totalorder %v126_v13, %v169_v12 }
  0xd8   :  { %v105_v6 = vpop.f32.mrb[0].mxu0 }
  0xd9   :  { %v167_v7 = vadd.f32 -2.0, %v105_v6  ;;  %v176_v8 = vpop.f32.mrb[1].mxu0 }
  0xdb   :  { %v110_v9 = vmul.f32 1.442695, %v167_v7 }
  0xdd   :  { %181 = vpow2.f32 %v110_v9 }
  0xe7   :  { %v182_v15 = vpop.eup %181 }
  0xe8   :  { %v132_v17 = vsel %vm121_vm3, %v182_v15, 0.0 }
  0xe9   :  { %v139_v18 = vadd.f32 %v138_v14, %v132_v17  ;;  %v133_v19 = vsel %vm131_vm4, %v132_v17, 0.0 }
  0xea   :  { %v135_v20 = vadd.f32 %v134_v16, %v133_v19 }
  0xeb   :  { %140 = vst.msk [vmem:[#allocation3] sm:$0xff] %vm27_vm0, %v139_v18 }
  0xec   :  { %137 = vst.msk [vmem:[#allocation2] sm:$0xff] %vm27_vm0, %v135_v20 }
  0xf2   :  { %v149_v23 = vld [vmem:[#allocation3] sm:$0xff] }
  0xf3   :  { %v144_v21 = vld [vmem:[#allocation2] sm:$0xff]  ;;  %v150_v24 = vsel %vm27_vm0, %v149_v23, 0.0 }
  0xf4   :  { %v145_v22 = vsel %vm27_vm0, %v144_v21, 0.0 }
  0xf5   :  { %146 = vadd.xlane.f32.xlu1 %v145_v22 }
  0xf9   :  { %151 = vadd.xlane.f32.xlu1 %v150_v24 }
 0x182   :  { %v147_v25 = vpop.xlane.xlu1 %146 }
 0x183   :  { %v148_v26 = vadd.f32 1.3533528e-09, %v147_v25 }
 0x185   :  { %183 = vlog2.f32 %v148_v26 }
 0x186   :  { %v152_v27 = vpop.xlane.xlu1 %151 }
 0x187   :  { %v153_v28 = vadd.f32 1.3533528e-09, %v152_v27 }
 0x189   :  { %185 = vlog2.f32 %v153_v28 }
 0x18f   :  { %v184_v29 = vpop.eup %183 }
 0x190   :  { %v157_v31 = vmul.f32 0.6931472, %v184_v29 }
 0x193   :  { %v186_v30 = vpop.eup %185 }
 0x194   :  { %v155_v32 = vmul.f32 0.6931472, %v186_v30 }
 0x196   :  { %v158_v33 = vsub.f32 %v155_v32, %v157_v31 }
 0x198   :  { %160 = vst.msk [vmem:[%s260_s6] sm:$0xff] %vm159_vm5, %v158_v33 }

</bundles_post_ra>
